<compile_context>
chip_gen: v5e
topology: v5e:2x2
jax: 0.10.0
libtpu: 0.0.40
codegen_flags: <defaults>
</compile_context>

<pallas_src>
import functools

import jax
import jax.numpy as jnp
from jax.experimental import pallas as pl
from jax.experimental.pallas import tpu as pltpu

_LANES = 128
_SUBLANES = 8
# 1024 sublane-blocks * 128 lanes = 131072 pixels per grid step.
# Per-step VMEM (double-buffered in+out) = 2 * (4+2) * 131072 * 4B ~= 6 MiB,
# comfortably inside the default scoped VMEM limit on v5e/v6e/v7x.
_S_TILE_CAP = 1024


def _interleave_mats():
    """0/1 'spread' matrices: E[k, 2k] = 1 and O[k, 2k+1] = 1 (bf16-exact)."""
    eye = jnp.eye(_LANES, dtype=jnp.float32)
    e = jnp.zeros((_LANES, 2 * _LANES), jnp.float32).at[:, 0::2].set(eye)
    o = jnp.zeros((_LANES, 2 * _LANES), jnp.float32).at[:, 1::2].set(eye)
    return e.astype(jnp.bfloat16), o.astype(jnp.bfloat16)


def _split_bf16(v):
    """hi/lo bf16 split of an f32 value; hi + lo ~= v to ~2^-17 relative."""
    hi = v.astype(jnp.bfloat16)
    lo = (v - hi.astype(jnp.float32)).astype(jnp.bfloat16)
    return hi, lo


def _project3d_kernel(p_ref, e_ref, o_ref, pts_ref, out_ref, *, eps):
    # p_ref:   SMEM (B, 12)          per-batch projection P (3x4), pre-scaled
    # e_ref:   VMEM (128, 256) bf16  even-lane spread matrix (fetched once)
    # o_ref:   VMEM (128, 256) bf16  odd-lane  spread matrix (fetched once)
    # pts_ref: VMEM (1, 4, S, 128)   tile of homogeneous points
    # out_ref: VMEM (1, S, 256)      interleaved pixel coords (x even / y odd)
    b = pl.program_id(0)

    X = pts_ref[0, 0]   # (S, 128) sublane-dense
    Y = pts_ref[0, 1]
    Z = pts_ref[0, 2]
    W = pts_ref[0, 3]

    # P entries read as scalars from SMEM (broadcast-multiplied on the VPU).
    p00 = p_ref[b, 0]; p01 = p_ref[b, 1]; p02 = p_ref[b, 2]; p03 = p_ref[b, 3]
    p10 = p_ref[b, 4]; p11 = p_ref[b, 5]; p12 = p_ref[b, 6]; p13 = p_ref[b, 7]
    p20 = p_ref[b, 8]; p21 = p_ref[b, 9]; p22 = p_ref[b, 10]; p23 = p_ref[b, 11]

    cam_x = p00 * X + p01 * Y + p02 * Z + p03 * W   # row 0 pre-scaled by 2/(W-1)
    cam_y = p10 * X + p11 * Y + p12 * Z + p13 * W   # row 1 pre-scaled by 2/(H-1)
    cam_z = p20 * X + p21 * Y + p22 * Z + p23 * W

    inv = pl.reciprocal(cam_z + eps, approx=False)
    xv = cam_x * inv
    yv = cam_y * inv

    # Pad the matmul M dim up to a native bf16 tile when the tile is tiny
    # (trace-time branch; a no-op for the large, 16-aligned production tiles).
    s = xv.shape[0]
    pad_rows = (-s) % 16
    if pad_rows:
        zeros = jnp.zeros((pad_rows, _LANES), jnp.float32)
        xv = jnp.concatenate([xv, zeros], axis=0)
        yv = jnp.concatenate([yv, zeros], axis=0)

    # Lane interleave on the MXU: out[:, 2k] = x[:, k], out[:, 2k+1] = y[:, k].
    x_hi, x_lo = _split_bf16(xv)
    y_hi, y_lo = _split_bf16(yv)
    e = e_ref[...]
    o = o_ref[...]
    acc = jnp.dot(x_hi, e, preferred_element_type=jnp.float32)
    acc = acc + jnp.dot(x_lo, e, preferred_element_type=jnp.float32)
    acc = acc + jnp.dot(y_hi, o, preferred_element_type=jnp.float32)
    acc = acc + jnp.dot(y_lo, o, preferred_element_type=jnp.float32)

    out_ref[0] = acc[:s] - 1.0


def _pick_pixel_tiling(s_needed, batch, cap=_S_TILE_CAP):
    """Pick (s_tile, num_tiles) for the pixel axis viewed as (s_needed, 128)."""
    s_tile = min(s_needed, cap)             # single full-dim block when it fits
    num_tiles = pl.cdiv(s_needed, s_tile)   # ragged last block is fine (no pad)
    # v7x has 2 TensorCores: give small problems at least 2 parallel steps.
    if batch * num_tiles < 2 and s_needed >= 2 * _SUBLANES:
        s_tile = pl.cdiv(pl.cdiv(s_needed, 2), _SUBLANES) * _SUBLANES
        num_tiles = pl.cdiv(s_needed, s_tile)
    return s_tile, num_tiles


def project3d(points, K, T, height, width, eps=1e-7):
    """points: (B, 4, H*W) f32, K: (4, 4) f32, T: (B, 4, 4) f32.

    Returns pix_coords of shape (B, H, W, 2), matching the PyTorch module.
    """
    points = points.astype(jnp.float32)
    B, four, N = points.shape
    assert four == 4 and N == height * width

    # Tiny 4x4 matmuls (K @ T) and the row slice are glue; plain JAX.
    P = jnp.matmul(jnp.broadcast_to(K[None].astype(jnp.float32), (B, 4, 4)),
                   T.astype(jnp.float32))[:, :3, :]            # (B, 3, 4)
    # Fold pixel normalization and the (x - 0.5) * 2 affine into rows 0/1 of P:
    #   out_x = (2/(W-1)) * cam_x / (cam_z + eps) - 1, likewise for y.
    scale = jnp.array([2.0 / (width - 1), 2.0 / (height - 1), 1.0], jnp.float32)
    P_flat = (P * scale[None, :, None]).reshape(B, 12)

    s_needed = pl.cdiv(N, _LANES)
    n_lane_padded = s_needed * _LANES
    if n_lane_padded != N:
        # Only when H*W is not a multiple of 128 (rare for image grids).
        # TODO(synk): mask the ragged lane tail in-kernel to avoid this copy.
        points = jnp.pad(points, ((0, 0), (0, 0), (0, n_lane_padded - N)))
    pts4 = points.reshape(B, 4, s_needed, _LANES)

    s_tile, num_tiles = _pick_pixel_tiling(s_needed, B)
    e_mat, o_mat = _interleave_mats()

    kernel = functools.partial(_project3d_kernel, eps=eps)
    out = pl.pallas_call(
        kernel,
        out_shape=jax.ShapeDtypeStruct((B, s_needed, 2 * _LANES), jnp.float32),
        grid_spec=pltpu.PrefetchScalarGridSpec(
            num_scalar_prefetch=0,
            grid=(B, num_tiles),
            in_specs=[
                # whole P matrix lives in SMEM, indexed by program_id(0)
                pl.BlockSpec(memory_space=pltpu.MemorySpace.SMEM),
                # constant index maps -> DMA'd once, stay VMEM-resident
                pl.BlockSpec((_LANES, 2 * _LANES), lambda b, t: (0, 0)),
                pl.BlockSpec((_LANES, 2 * _LANES), lambda b, t: (0, 0)),
                pl.BlockSpec((1, 4, s_tile, _LANES), lambda b, t: (b, 0, t, 0)),
            ],
            out_specs=pl.BlockSpec((1, s_tile, 2 * _LANES),
                                   lambda b, t: (b, t, 0)),
        ),
        # Both axes independent: shardable across the two TensorCores on v7x.
        compiler_params=pltpu.CompilerParams(
            dimension_semantics=("parallel", "parallel")),
    )(P_flat, e_mat, o_mat, pts4)

    # Output is already pixel-major / channel-minor: pure reshape, no
    # transpose, no extra HBM pass.
    pix = out.reshape(B, n_lane_padded, 2)
    if n_lane_padded != N:
        pix = pix[:, :N, :]
    return pix.reshape(B, height, width, 2)


def _project3d_ref(points, K, T, height, width, eps=1e-7):
    """Pure-JAX reference mirroring the PyTorch forward exactly."""
    B = points.shape[0]
    Kb = jnp.broadcast_to(K[None], (B, 4, 4))
    P = jnp.matmul(Kb, T)[:, :3, :]
    cam = jnp.matmul(P, points)
    pix = cam[:, :2, :] / (cam[:, 2, :][:, None, :] + eps)
    pix = pix.reshape(B, 2, height, width).transpose(0, 2, 3, 1)
    pix = pix.at[..., 0].divide(width - 1)
    pix = pix.at[..., 1].divide(height - 1)
    return (pix - 0.5) * 2


if __name__ == "__main__":
    B, H, W = 2, 16, 16
    N = H * W
    key = jax.random.PRNGKey(0)
    kx, kz, kt = jax.random.split(key, 3)

    # Homogeneous points: x,y in [-1,1], z in [1,2], w = 1 (keeps z well away
    # from the eps-guarded divide).
    xy = jax.random.uniform(kx, (B, 2, N), jnp.float32, minval=-1.0, maxval=1.0)
    z = jax.random.uniform(kz, (B, 1, N), jnp.float32, minval=1.0, maxval=2.0)
    ones = jnp.ones((B, 1, N), jnp.float32)
    points = jnp.concatenate([xy, z, ones], axis=1)            # (B, 4, N)

    # Deterministic intrinsics and camera poses.
    K = jnp.array([[0.58 * W, 0.0,      0.5 * W, 0.0],
                   [0.0,      1.92 * H, 0.5 * H, 0.0],
                   [0.0,      0.0,      1.0,     0.0],
                   [0.0,      0.0,      0.0,     1.0]], jnp.float32)
    T = jnp.broadcast_to(jnp.eye(4, dtype=jnp.float32)[None], (B, 4, 4))
    T = T + 0.01 * jax.random.normal(kt, (B, 4, 4), jnp.float32)

    out = project3d(points, K, T, H, W)
    out = jax.block_until_ready(out)

    ref = _project3d_ref(points, K, T, H, W)
    assert out.shape == (B, H, W, 2)
    assert jnp.allclose(out, ref, atol=1e-4, rtol=1e-4), (
        f"max abs err {jnp.max(jnp.abs(out - ref))}")

    print("KERNEL_OK")
</pallas_src>

<mosaic_0001>
module attributes {stable_mosaic.version = 11 : i64} {
  func.func @_project3d_kernel(%arg0: i32, %arg1: i32, %arg2: memref<2x12xf32, #tpu.memory_space<smem>>, %arg3: memref<128x256xbf16, #tpu.memory_space<vmem>>, %arg4: memref<128x256xbf16, #tpu.memory_space<vmem>>, %arg5: memref<1x4x2x128xf32, #tpu.memory_space<vmem>>, %arg6: memref<1x2x256xf32, #tpu.memory_space<vmem>>) attributes {dimension_semantics = [#tpu.dimension_semantics<parallel>, #tpu.dimension_semantics<parallel>], iteration_bounds = array<i64: 2, 1>, scalar_prefetch = 0 : i64, scratch_operands = 0 : i64, tpu.core_type = #tpu.core_type<tc>, window_params = [{transform_indices = @transform_0, window_bounds = array<i64: 2, 12>}, {pipeline_mode = #tpu.pipeline_mode<synchronous>, transform_indices = @transform_1, window_bounds = array<i64: 128, 256>}, {pipeline_mode = #tpu.pipeline_mode<synchronous>, transform_indices = @transform_2, window_bounds = array<i64: 128, 256>}, {transform_indices = @transform_3, window_bounds = array<i64: 1, 4, 2, 128>}, {transform_indices = @transform_4, window_bounds = array<i64: 1, 2, 256>}]} {
    %c0 = arith.constant 0 : index
    %c0_0 = arith.constant 0 : index
    %c0_1 = arith.constant 0 : index
    %c0_2 = arith.constant 0 : index
    %0 = vector.load %arg5[%c0, %c0_0, %c0_1, %c0_2] : memref<1x4x2x128xf32, #tpu.memory_space<vmem>>, vector<1x1x2x128xf32>
    %1 = vector.shape_cast %0 : vector<1x1x2x128xf32> to vector<2x128xf32>
    %c0_3 = arith.constant 0 : index
    %c1 = arith.constant 1 : index
    %c0_4 = arith.constant 0 : index
    %c0_5 = arith.constant 0 : index
    %2 = vector.load %arg5[%c0_3, %c1, %c0_4, %c0_5] : memref<1x4x2x128xf32, #tpu.memory_space<vmem>>, vector<1x1x2x128xf32>
    %3 = vector.shape_cast %2 : vector<1x1x2x128xf32> to vector<2x128xf32>
    %c0_6 = arith.constant 0 : index
    %c2 = arith.constant 2 : index
    %c0_7 = arith.constant 0 : index
    %c0_8 = arith.constant 0 : index
    %4 = vector.load %arg5[%c0_6, %c2, %c0_7, %c0_8] : memref<1x4x2x128xf32, #tpu.memory_space<vmem>>, vector<1x1x2x128xf32>
    %5 = vector.shape_cast %4 : vector<1x1x2x128xf32> to vector<2x128xf32>
    %c0_9 = arith.constant 0 : index
    %c3 = arith.constant 3 : index
    %c0_10 = arith.constant 0 : index
    %c0_11 = arith.constant 0 : index
    %6 = vector.load %arg5[%c0_9, %c3, %c0_10, %c0_11] : memref<1x4x2x128xf32, #tpu.memory_space<vmem>>, vector<1x1x2x128xf32>
    %7 = vector.shape_cast %6 : vector<1x1x2x128xf32> to vector<2x128xf32>
    %8 = arith.index_cast %arg0 : i32 to index
    %c0_12 = arith.constant 0 : index
    %9 = memref.load %arg2[%8, %c0_12] : memref<2x12xf32, #tpu.memory_space<smem>>
    %10 = arith.index_cast %arg0 : i32 to index
    %c1_13 = arith.constant 1 : index
    %11 = memref.load %arg2[%10, %c1_13] : memref<2x12xf32, #tpu.memory_space<smem>>
    %12 = arith.index_cast %arg0 : i32 to index
    %c2_14 = arith.constant 2 : index
    %13 = memref.load %arg2[%12, %c2_14] : memref<2x12xf32, #tpu.memory_space<smem>>
    %14 = arith.index_cast %arg0 : i32 to index
    %c3_15 = arith.constant 3 : index
    %15 = memref.load %arg2[%14, %c3_15] : memref<2x12xf32, #tpu.memory_space<smem>>
    %16 = arith.index_cast %arg0 : i32 to index
    %c4 = arith.constant 4 : index
    %17 = memref.load %arg2[%16, %c4] : memref<2x12xf32, #tpu.memory_space<smem>>
    %18 = arith.index_cast %arg0 : i32 to index
    %c5 = arith.constant 5 : index
    %19 = memref.load %arg2[%18, %c5] : memref<2x12xf32, #tpu.memory_space<smem>>
    %20 = arith.index_cast %arg0 : i32 to index
    %c6 = arith.constant 6 : index
    %21 = memref.load %arg2[%20, %c6] : memref<2x12xf32, #tpu.memory_space<smem>>
    %22 = arith.index_cast %arg0 : i32 to index
    %c7 = arith.constant 7 : index
    %23 = memref.load %arg2[%22, %c7] : memref<2x12xf32, #tpu.memory_space<smem>>
    %24 = arith.index_cast %arg0 : i32 to index
    %c8 = arith.constant 8 : index
    %25 = memref.load %arg2[%24, %c8] : memref<2x12xf32, #tpu.memory_space<smem>>
    %26 = arith.index_cast %arg0 : i32 to index
    %c9 = arith.constant 9 : index
    %27 = memref.load %arg2[%26, %c9] : memref<2x12xf32, #tpu.memory_space<smem>>
    %28 = arith.index_cast %arg0 : i32 to index
    %c10 = arith.constant 10 : index
    %29 = memref.load %arg2[%28, %c10] : memref<2x12xf32, #tpu.memory_space<smem>>
    %30 = arith.index_cast %arg0 : i32 to index
    %c11 = arith.constant 11 : index
    %31 = memref.load %arg2[%30, %c11] : memref<2x12xf32, #tpu.memory_space<smem>>
    %32 = vector.broadcast %9 : f32 to vector<2x128xf32>
    %33 = arith.mulf %32, %1 : vector<2x128xf32>
    %34 = vector.broadcast %11 : f32 to vector<2x128xf32>
    %35 = arith.mulf %34, %3 : vector<2x128xf32>
    %36 = arith.addf %33, %35 : vector<2x128xf32>
    %37 = vector.broadcast %13 : f32 to vector<2x128xf32>
    %38 = arith.mulf %37, %5 : vector<2x128xf32>
    %39 = arith.addf %36, %38 : vector<2x128xf32>
    %40 = vector.broadcast %15 : f32 to vector<2x128xf32>
    %41 = arith.mulf %40, %7 : vector<2x128xf32>
    %42 = arith.addf %39, %41 : vector<2x128xf32>
    %43 = vector.broadcast %17 : f32 to vector<2x128xf32>
    %44 = arith.mulf %43, %1 : vector<2x128xf32>
    %45 = vector.broadcast %19 : f32 to vector<2x128xf32>
    %46 = arith.mulf %45, %3 : vector<2x128xf32>
    %47 = arith.addf %44, %46 : vector<2x128xf32>
    %48 = vector.broadcast %21 : f32 to vector<2x128xf32>
    %49 = arith.mulf %48, %5 : vector<2x128xf32>
    %50 = arith.addf %47, %49 : vector<2x128xf32>
    %51 = vector.broadcast %23 : f32 to vector<2x128xf32>
    %52 = arith.mulf %51, %7 : vector<2x128xf32>
    %53 = arith.addf %50, %52 : vector<2x128xf32>
    %54 = vector.broadcast %25 : f32 to vector<2x128xf32>
    %55 = arith.mulf %54, %1 : vector<2x128xf32>
    %56 = vector.broadcast %27 : f32 to vector<2x128xf32>
    %57 = arith.mulf %56, %3 : vector<2x128xf32>
    %58 = arith.addf %55, %57 : vector<2x128xf32>
    %59 = vector.broadcast %29 : f32 to vector<2x128xf32>
    %60 = arith.mulf %59, %5 : vector<2x128xf32>
    %61 = arith.addf %58, %60 : vector<2x128xf32>
    %62 = vector.broadcast %31 : f32 to vector<2x128xf32>
    %63 = arith.mulf %62, %7 : vector<2x128xf32>
    %64 = arith.addf %61, %63 : vector<2x128xf32>
    %cst = arith.constant 1.000000e-07 : f32
    %65 = vector.broadcast %cst : f32 to vector<2x128xf32>
    %66 = arith.addf %64, %65 : vector<2x128xf32>
    %67 = tpu.reciprocal %66 : vector<2x128xf32> -> vector<2x128xf32>
    %68 = arith.mulf %42, %67 : vector<2x128xf32>
    %69 = arith.mulf %53, %67 : vector<2x128xf32>
    %cst_16 = arith.constant 0.000000e+00 : f32
    %70 = vector.broadcast %cst_16 : f32 to vector<14x128xf32>
    %71 = tpu.concatenate %68, %70 in 0 : vector<2x128xf32>, vector<14x128xf32> -> vector<16x128xf32>
    %72 = tpu.concatenate %69, %70 in 0 : vector<2x128xf32>, vector<14x128xf32> -> vector<16x128xf32>
    %73 = arith.truncf %71 : vector<16x128xf32> to vector<16x128xbf16>
    %74 = arith.extf %73 : vector<16x128xbf16> to vector<16x128xf32>
    %75 = arith.subf %71, %74 : vector<16x128xf32>
    %76 = arith.truncf %75 : vector<16x128xf32> to vector<16x128xbf16>
    %77 = arith.truncf %72 : vector<16x128xf32> to vector<16x128xbf16>
    %78 = arith.extf %77 : vector<16x128xbf16> to vector<16x128xf32>
    %79 = arith.subf %72, %78 : vector<16x128xf32>
    %80 = arith.truncf %79 : vector<16x128xf32> to vector<16x128xbf16>
    %c0_17 = arith.constant 0 : index
    %c0_18 = arith.constant 0 : index
    %81 = vector.load %arg3[%c0_17, %c0_18] : memref<128x256xbf16, #tpu.memory_space<vmem>>, vector<128x256xbf16>
    %c0_19 = arith.constant 0 : index
    %c0_20 = arith.constant 0 : index
    %82 = vector.load %arg4[%c0_19, %c0_20] : memref<128x256xbf16, #tpu.memory_space<vmem>>, vector<128x256xbf16>
    %cst_21 = arith.constant dense<0.000000e+00> : vector<16x256xf32>
    %83 = tpu.matmul %73, %81, %cst_21 {dimension_numbers = #tpu.dot_dimension_numbers<[1], [0], [0], [1], [0, 0, 1, 1], [], []>} : vector<16x128xbf16>, vector<128x256xbf16>, vector<16x256xf32> -> vector<16x256xf32>
    %cst_22 = arith.constant dense<0.000000e+00> : vector<16x256xf32>
    %84 = tpu.matmul %76, %81, %cst_22 {dimension_numbers = #tpu.dot_dimension_numbers<[1], [0], [0], [1], [0, 0, 1, 1], [], []>} : vector<16x128xbf16>, vector<128x256xbf16>, vector<16x256xf32> -> vector<16x256xf32>
    %85 = arith.addf %83, %84 : vector<16x256xf32>
    %cst_23 = arith.constant dense<0.000000e+00> : vector<16x256xf32>
    %86 = tpu.matmul %77, %82, %cst_23 {dimension_numbers = #tpu.dot_dimension_numbers<[1], [0], [0], [1], [0, 0, 1, 1], [], []>} : vector<16x128xbf16>, vector<128x256xbf16>, vector<16x256xf32> -> vector<16x256xf32>
    %87 = arith.addf %85, %86 : vector<16x256xf32>
    %cst_24 = arith.constant dense<0.000000e+00> : vector<16x256xf32>
    %88 = tpu.matmul %80, %82, %cst_24 {dimension_numbers = #tpu.dot_dimension_numbers<[1], [0], [0], [1], [0, 0, 1, 1], [], []>} : vector<16x128xbf16>, vector<128x256xbf16>, vector<16x256xf32> -> vector<16x256xf32>
    %89 = arith.addf %87, %88 : vector<16x256xf32>
    %90 = vector.extract_strided_slice %89 {offsets = [0, 0], sizes = [2, 256], strides = [1, 1]} : vector<16x256xf32> to vector<2x256xf32>
    %cst_25 = arith.constant 1.000000e+00 : f32
    %91 = vector.broadcast %cst_25 : f32 to vector<2x256xf32>
    %92 = arith.subf %90, %91 : vector<2x256xf32>
    %c0_26 = arith.constant 0 : index
    %c0_27 = arith.constant 0 : index
    %c0_28 = arith.constant 0 : index
    %93 = vector.load %arg6[%c0_26, %c0_27, %c0_28] : memref<1x2x256xf32, #tpu.memory_space<vmem>>, vector<1x2x256xf32>
    %94 = vector.shape_cast %93 : vector<1x2x256xf32> to vector<2x256xf32>
    %95 = vector.shape_cast %92 : vector<2x256xf32> to vector<1x2x256xf32>
    tpu.vector_store %arg6[%c0_26, %c0_27, %c0_28], %95 {strides = array<i32>} : memref<1x2x256xf32, #tpu.memory_space<vmem>>, vector<1x2x256xf32>,
    return
  }
  func.func @transform_0(%arg0: i32, %arg1: i32) -> (i32, i32) {
    %c0_i32 = arith.constant 0 : i32
    %c0_i32_0 = arith.constant 0 : i32
    %c0_i32_1 = arith.constant 0 : i32
    return %c0_i32, %c0_i32_0 : i32, i32
  }
  func.func @transform_1(%arg0: i32, %arg1: i32) -> (i32, i32) {
    %c0_i32 = arith.constant 0 : i32
    %c0_i32_0 = arith.constant 0 : i32
    %c0_i32_1 = arith.constant 0 : i32
    return %c0_i32, %c0_i32_0 : i32, i32
  }
  func.func @transform_2(%arg0: i32, %arg1: i32) -> (i32, i32) {
    %c0_i32 = arith.constant 0 : i32
    %c0_i32_0 = arith.constant 0 : i32
    %c0_i32_1 = arith.constant 0 : i32
    return %c0_i32, %c0_i32_0 : i32, i32
  }
  func.func @transform_3(%arg0: i32, %arg1: i32) -> (i32, i32, i32, i32) {
    %c0_i32 = arith.constant 0 : i32
    %c0_i32_0 = arith.constant 0 : i32
    %c0_i32_1 = arith.constant 0 : i32
    return %arg0, %c0_i32, %arg1, %c0_i32_0 : i32, i32, i32, i32
  }
  func.func @transform_4(%arg0: i32, %arg1: i32) -> (i32, i32, i32) {
    %c0_i32 = arith.constant 0 : i32
    %c0_i32_0 = arith.constant 0 : i32
    return %arg0, %arg1, %c0_i32 : i32, i32, i32
  }
}

</mosaic_0001>

<bundles_post_ra>
// kernel: tpu_custom_call.1
= control target key start
LH: loop header
LB: loop body
LE: loop exit
PB: predicated region body
PF: predicated region fallthrough
CT: control target
= control target key end

     0   :  { %s1611_s0 = inlined_call_operand.hbm [shape: f32[2,12], index: 0, kind: input, shape index: {}]   ;;  %s1612_s1 = inlined_call_operand.hbm [shape: bf16[128,256], index: 1, kind: input, shape index: {}]   ;;  %s1613_s2 = inlined_call_operand.hbm [shape: bf16[128,256], index: 2, kind: input, shape index: {}]   ;;  %s1614_s3 = inlined_call_operand.hbm [shape: f32[2,4,2,128], index: 3, kind: input, shape index: {}]   ;;  %s1615_s4 = inlined_call_operand.hbm [shape: f32[2,2,256], index: 4, kind: output, shape index: {}]  }
   0x1   :  { %1616 = sst [smem:[#allocation16_spill]] %s1611_s0 }
   0x2   :  { %1617 = sst [smem:[#allocation17_spill]] %s1612_s1 }
   0x3   :  { %9 = vsyncpa [#allocation5], 0 }
   0x4   :  { %10 = vsyncpa [#allocation3], 0 }
   0x5   :  { %11 = vsyncpa [#allocation8], 0 }
   0x6   :  { %12 = vsyncpa [#allocation4], 0 }
   0x7   :  { %14 = vsyncpa [#allocation4 + $0x1], 0  ;;  %s1349_s15 = smov 0   ;;  %s1351_s16 = smov 0  }
   0x8   :  { %s1353_s17 = smov 0   ;;  %s1355_s18 = smov 0  }
   0x9   :  { %s1357_s19 = smov 0   ;;  %s1359_s20 = smov 0  }
   0xa LB: > { %s1380_s21 = sadd.s32 4294967295, %s1314_s20   ;;  %s827_s22 = sadd.s32 4294967294, %s1314_s20   ;;  %s1314_s20 = sphi %s1359_s20, %s20_s20   ;;  %s1310_s19 = sphi %s1357_s19, %s1630_s19   ;;  %s1306_s18 = sphi %s1355_s18, %s1629_s18   ;;  %s1302_s17 = sphi %s1353_s17, %s1628_s17   ;;  %s1298_s16 = sphi %s1351_s16, %s1627_s16   ;;  %s1294_s15 = sphi %s1349_s15, %s1626_s15  }
   0xb   : > { %p117_p0 = scmp.ne.s32.totalorder %s1298_s16, %s1294_s15  ;;  %p118_p1 = scmp.eq.s32.totalorder %s1380_s21, 0 }
   0xc   : > { %p143_p2 = scmp.eq.s32.totalorder %s1380_s21, 1  ;;  %p149_p3 = scmp.eq.s32.totalorder %s827_s22, 1 }
   0xd   : > { %p1389_p4 = por %p118_p1, %p117_p0  ;;  %p828_p5 = scmp.ge.s32.totalorder %s1314_s20, 1 }
   0xe   : > { %p1394_p6 = por %p149_p3, %p117_p0  ;;  %p156_p7 = scmp.lt.s32.totalorder %s1314_s20, 3 }
   0xf   : > { %s1620_s1 = sld [smem:[#allocation17_spill]]  ;;  %s1316_s29 = smov [#allocation6]  }
  0x10   : > { %p1402_p8 = pnand %p828_p5, %p156_p7  ;;  %s179_s30 = sshll.u32 %s1316_s29, 4  ;;  %s180_s30 = int_to_ptr.vmem [resolvable:$true] %s179_s30 }
  0x11   : > { %p832_p11 = scmp.ge.s32.totalorder %s1314_s20, 2  ;;  %s1623_s0 = sld [smem:[#allocation16_spill]] }
  0x12   : > { %p1031_p9 = pneg %p1402_p8  ;;  %s1317_s9 = smov 128  }
  0x13   : > { %s1318_s10 = smov 8   ;;  %s1319_s11 = smov [#allocation2]  }
  0x14   : > { %p1410_p10 = pnand %p1031_p9, %p118_p1  ;;  %s191_s14 = sshll.u32 %s1613_s2, 4  ;;  %s192_s14 = int_to_ptr.hbm [resolvable:$true] %s191_s14 }
  0x15   : > { %s177_s27 = sshll.u32 %s1620_s1, 4  ;;  %s1320_s22 = smov [#allocation7]   ;;  %s178_s27 = int_to_ptr.hbm [resolvable:$true] %s177_s27 }
  0x16   : > { %1037 = dma.hbm_to_vmem [thread:$0]  (!%p1410_p10), %s178_s27, 2048, %s180_s30, [#allocation3], %s1317_s9, %s1317_s9, %s1318_s10  }
  0x17   : > { %s168_s8 = sshll.u32 %s1623_s0, 4  ;;  %s193_s25 = sshll.u32 %s1320_s22, 4  ;;  %s169_s8 = int_to_ptr.hbm [resolvable:$true] %s168_s8  ;;  %s194_s25 = int_to_ptr.vmem [resolvable:$true] %s193_s25 }
  0x18   : > { %1034 = dma.hbm_to_smem (!%p1410_p10), %s169_s8, 32, %s1319_s11, [#allocation5]  }
  0x19   : > { %1040 = dma.hbm_to_vmem [thread:$0]  (!%p1410_p10), %s192_s14, 2048, %s194_s25, [#allocation8], %s1317_s9, %s1317_s9, %s1318_s10  }
  0x1a   : > { %s104_s26 = sadd.s32 1, %s1302_s17  ;;  %s32_s27 = sadd.s32 1, %s1310_s19 }
  0x1b   : > { %p111_p12 = scmp.ne.s32.totalorder %s1302_s17, %s1298_s16  ;;  %p34_p13 = scmp.ge.s32.totalorder %s32_s27, 2 }
  0x1c   : > { %p112_p0 = scmp.eq.s32.totalorder %s1314_s20, 0  ;;  %p1052_p5 = scmp.lt.s32.totalorder %s1314_s20, 2 }
  0x1d   : > { %p1434_p3 = por %p143_p2, %p111_p12  ;;  %s1632_s27 = smov (%p34_p13, %s32_s27), 0 }
  0x1e   : > { %p1441_p7 = por %p112_p0, %p111_p12  ;;  %s207_s5 = sand.u32 1, %s1314_s20  }
  0x1f   : > { %s99_s6 = ssub.s32 %s1310_s19, %s1632_s27  ;;  %s209_s7 = sand.u32 1, %s1302_s17  }
  0x20   : > { %p102_p9 = scmp.eq.s32.totalorder %s99_s6, 0  ;;  %s833_s8 = sshll.u32 %s209_s7, 3 }
  0x21   : > { %s981_s9 = sshll.u32 %s1310_s19, 3  ;;  %s211_s22 = scalar_lea.vmem [#allocation9], %s833_s8 }
  0x22   : > { %s1451_s10 = scalar_select %p102_p9, %s1302_s17, %s104_s26  }
  0x23   : > { %s217_s13 = scalar_lea.hbm %s1614_s3, %s981_s9  ;;  %s220_s25 = sshll.u32 %s211_s22, 4  ;;  %s221_s25 = int_to_ptr.vmem [resolvable:$true] %s220_s25 }
  0x24   : > { %s218_s14 = sshll.u32 %s217_s13, 4  ;;  %p1042_p2 = pnand %p1052_p5, %p1441_p7  ;;  %s219_s14 = int_to_ptr.hbm [resolvable:$true] %s218_s14 }
  0x25   : > { %s208_s0 = scalar_lea.sflag [#allocation3], %s207_s5  ;;  %s1321_s1 = smov 32  }
  0x26   : > { %s1322_s6 = smov 2   ;;  %232 = sbr.rel (%p1402_p8) target bundleno = 269 (0x10d), region = 36 }
  0x27   : > { %1044 = dma.hbm_to_vmem [thread:$0]  (!%p1042_p2), %s219_s14, 128, %s221_s25, %s208_s0, %s1321_s1, %s1321_s1, %s1322_s6  }
  0x2b   : > { %1273 = dma.done.wait (%p118_p1), [#allocation5], 32  }
  0x2c   : > { %1275 = vsyncadd (%p118_p1), [#allocation5], 4294967264 }
  0x2d   : > { %1277 = dma.done.wait (%p118_p1), [#allocation3], 2048  }
  0x2e   : > { %1279 = vsyncadd (%p118_p1), [#allocation3], 4294965248 }
  0x2f   : > { %1281 = dma.done.wait (%p118_p1), [#allocation8], 2048  }
  0x30   : > { %1283 = vsyncadd (%p118_p1), [#allocation8], 4294965248  ;;  %s249_s0 = sand.u32 1, %s1380_s21   ;;  %s1476_s1 = sand.u32 1, %s1298_s16  }
  0x31   : > { %s840_s28 = sshll.u32 %s1476_s1, 3  ;;  %s250_s26 = scalar_lea.sflag [#allocation3], %s249_s0 }
  0x32   : > { %s1479_s30 = scalar_lea.vmem [#allocation9], %s840_s28 }
  0x33   : > { %1285 = dma.done.wait (%p1389_p4), %s250_s26, 128  }
  0x34   : > { %1287 = vsyncadd (%p1389_p4), %s250_s26, 4294967168 }
  0x35   : > { %259 = sfence }
  0x36   : > { %v904_v0 = vld [vmem:[#allocation6 + $0x70] sm:$0xf]  ;;  %v997_v1 = vld [vmem:[#allocation6 + $0x74] sm:$0xf0]  ;;  %v996_v2 = vld [vmem:[#allocation6 + $0x74] sm:$0xf] }
  0x37   : > { %v905_v3 = vor.u32 %v997_v1, %v904_v0  ;;  %v906_v4 = vld [vmem:[#allocation6 + $0x78] sm:$0xf0]  ;;  %v896_v5 = vld [vmem:[#allocation6 + $0x60] sm:$0xf]  ;;  %v995_v6 = vld [vmem:[#allocation6 + $0x64] sm:$0xf0] }
  0x38   : > { %v909_v7 = vor.u32 %v996_v2, %v906_v4  ;;  %v994_v8 = vld [vmem:[#allocation6 + $0x64] sm:$0xf]  ;;  %v898_v9 = vld [vmem:[#allocation6 + $0x68] sm:$0xf0]  ;;  %v897_v10 = vor.u32 %v995_v6, %v896_v5  ;;  %v888_v12 = vld [vmem:[#allocation6 + $0x50] sm:$0xf] }
  0x39   : > { %487 = vmatpush.bf16.msra.mxu0 %v905_v3  ;;  %519 = vmatpush.bf16.msra.mxu2 %v905_v3  ;;  %v901_v11 = vor.u32 %v994_v8, %v898_v9  ;;  %v993_v13 = vld [vmem:[#allocation6 + $0x54] sm:$0xf0]  ;;  %v992_v14 = vld [vmem:[#allocation6 + $0x54] sm:$0xf]  ;;  %v890_v15 = vld [vmem:[#allocation6 + $0x58] sm:$0xf0] }
  0x3a   : > { %500 = vmatpush.bf16.msra.mxu1 %v909_v7  ;;  %532 = vmatpush.bf16.msra.mxu3 %v909_v7  ;;  %v889_v16 = vor.u32 %v993_v13, %v888_v12  ;;  %v893_v17 = vor.u32 %v992_v14, %v890_v15  ;;  %v880_v18 = vld [vmem:[#allocation6 + $0x40] sm:$0xf]  ;;  %v991_v19 = vld [vmem:[#allocation6 + $0x44] sm:$0xf0]  ;;  %v990_v20 = vld [vmem:[#allocation6 + $0x44] sm:$0xf] }
  0x3b   : > { %v882_v21 = vld [vmem:[#allocation6 + $0x48] sm:$0xf0]  ;;  %v881_v22 = vor.u32 %v991_v19, %v880_v18  ;;  %v872_v24 = vld [vmem:[#allocation6 + $0x30] sm:$0xf]  ;;  %v989_v25 = vld [vmem:[#allocation6 + $0x34] sm:$0xf0] }
  0x3c   : > { %v885_v23 = vor.u32 %v990_v20, %v882_v21  ;;  %v988_v26 = vld [vmem:[#allocation6 + $0x34] sm:$0xf]  ;;  %v874_v27 = vld [vmem:[#allocation6 + $0x38] sm:$0xf0]  ;;  %v873_v28 = vor.u32 %v989_v25, %v872_v24  ;;  %v864_v30 = vld [vmem:[#allocation6 + $0x20] sm:$0xf] }
  0x3d   : > { %488 = vmatpush.bf16.msra.mxu0 %v897_v10  ;;  %520 = vmatpush.bf16.msra.mxu2 %v897_v10  ;;  %v877_v29 = vor.u32 %v988_v26, %v874_v27  ;;  %v987_v31 = vld [vmem:[#allocation6 + $0x24] sm:$0xf0]  ;;  %v986_v32 = vld [vmem:[#allocation6 + $0x24] sm:$0xf]  ;;  %v866_v33 = vld [vmem:[#allocation6 + $0x28] sm:$0xf0] }
  0x3e   : > { %501 = vmatpush.bf16.msra.mxu1 %v901_v11  ;;  %533 = vmatpush.bf16.msra.mxu3 %v901_v11  ;;  %v865_v34 = vor.u32 %v987_v31, %v864_v30  ;;  %v869_v35 = vor.u32 %v986_v32, %v866_v33  ;;  %v856_v36 = vld [vmem:[#allocation6 + $0x10] sm:$0xf]  ;;  %v985_v37 = vld [vmem:[#allocation6 + $0x14] sm:$0xf0]  ;;  %v984_v38 = vld [vmem:[#allocation6 + $0x14] sm:$0xf] }
  0x3f   : > { %v858_v39 = vld [vmem:[#allocation6 + $0x18] sm:$0xf0]  ;;  %s1486_s21 = sshll.u32 %s1306_s18, 7  ;;  %v857_v40 = vor.u32 %v985_v37, %v856_v36  ;;  %v848_v41 = vld [vmem:[#allocation6] sm:$0xf]  ;;  %vm361_vm4 = vcmask 1041408  }
  0x40   : > { %v861_v42 = vor.u32 %v984_v38, %v858_v39  ;;  %v983_v43 = vld [vmem:[#allocation6 + $0x4] sm:$0xf0]  ;;  %v982_v44 = vld [vmem:[#allocation6 + $0x4] sm:$0xf]  ;;  %v850_v45 = vld [vmem:[#allocation6 + $0x8] sm:$0xf0] }
  0x41   : > { %489 = vmatpush.bf16.msra.mxu0 %v889_v16  ;;  %521 = vmatpush.bf16.msra.mxu2 %v889_v16  ;;  %v968_v46 = vld [vmem:[#allocation7 + $0x70] sm:$0xf]  ;;  %v1013_v47 = vld [vmem:[#allocation7 + $0x74] sm:$0xf0]  ;;  %s303_s23 = sadd.s32 8, %s1486_s21  ;;  %s305_s7 = sadd.s32 9, %s1486_s21  ;;  %v849_v50 = vor.u32 %v983_v43, %v848_v41  ;;  %v853_v51 = vor.u32 %v982_v44, %v850_v45 }
  0x42   : > { %502 = vmatpush.bf16.msra.mxu1 %v893_v17  ;;  %534 = vmatpush.bf16.msra.mxu3 %v893_v17  ;;  %v1012_v48 = vld [vmem:[#allocation7 + $0x74] sm:$0xf]  ;;  %v970_v49 = vld [vmem:[#allocation7 + $0x78] sm:$0xf0]  ;;  %s1489_s5 = sld [smem:[#allocation2 + %s303_s23]]  ;;  %s307_s9 = sadd.s32 10, %s1486_s21  ;;  %v969_v52 = vor.u32 %v1013_v47, %v968_v46 }
  0x43   : > { %s1492_s8 = sld [smem:[#allocation2 + %s305_s7]]  ;;  %s309_s12 = sadd.s32 11, %s1486_s21  ;;  %v973_v53 = vor.u32 %v1012_v48, %v970_v49  ;;  %v960_v54 = vld [vmem:[#allocation7 + $0x60] sm:$0xf]  ;;  %v1011_v55 = vld [vmem:[#allocation7 + $0x64] sm:$0xf0] }
  0x44   : > { %s1495_s11 = sld [smem:[#allocation2 + %s307_s9]]  ;;  %s289_s13 = sadd.s32 1, %s1486_s21  ;;  %v1010_v56 = vld [vmem:[#allocation7 + $0x64] sm:$0xf]  ;;  %v962_v57 = vld [vmem:[#allocation7 + $0x68] sm:$0xf0]  ;;  %v961_v63 = vor.u32 %v1011_v55, %v960_v54 }
  0x45   : > { %490 = vmatpush.bf16.msra.mxu0 %v881_v22  ;;  %522 = vmatpush.bf16.msra.mxu2 %v881_v22  ;;  %s1499_s14 = sld [smem:[#allocation2 + %s309_s12]]  ;;  %v1502_v58 = vld [vmem:[%s1479_s30] sm:$0x3]  ;;  %v1505_v59 = vld [vmem:[%s1479_s30 + $0x2] sm:$0x3]  ;;  %s291_s25 = sadd.s32 2, %s1486_s21  ;;  %v965_v0 = vor.u32 %v1010_v56, %v962_v57 }
  0x46   : > { %503 = vmatpush.bf16.msra.mxu1 %v885_v23  ;;  %535 = vmatpush.bf16.msra.mxu3 %v885_v23  ;;  %s1508_s22 = sld [smem:[#allocation2 + %s1486_s21]]  ;;  %v952_v60 = vld [vmem:[#allocation7 + $0x50] sm:$0xf]  ;;  %v1512_v61 = vld [vmem:[%s1479_s30 + $0x4] sm:$0x3]  ;;  %s295_s0 = sadd.s32 4, %s1486_s21 }
  0x47   : > { %s1514_s6 = sld [smem:[#allocation2 + %s289_s13]]  ;;  %v1009_v1 = vld [vmem:[#allocation7 + $0x54] sm:$0xf0]  ;;  %v1519_v2 = vld [vmem:[%s1479_s30 + $0x6] sm:$0x3]  ;;  %s297_s28 = sadd.s32 5, %s1486_s21 }
  0x48   : > { %v333_v62 = vstv %s1489_s5  ;;  %v1008_v5 = vld [vmem:[#allocation7 + $0x54] sm:$0xf]  ;;  %v954_v6 = vld [vmem:[#allocation7 + $0x58] sm:$0xf0]  ;;  %s1524_s26 = sld [smem:[#allocation2 + %s291_s25]]  ;;  %s293_s30 = sadd.s32 3, %s1486_s21  ;;  %v953_v13 = vor.u32 %v1009_v1, %v952_v60 }
  0x49   : > { %491 = vmatpush.bf16.msra.mxu0 %v873_v28  ;;  %523 = vmatpush.bf16.msra.mxu2 %v873_v28  ;;  %v334_v3 = vmul.f32 %v333_v62, %v1502_v58  ;;  %v335_v4 = vstv %s1492_s8  ;;  %s1528_s23 = sld [smem:[#allocation2 + %s295_s0]]  ;;  %v957_v14 = vor.u32 %v1008_v5, %v954_v6  ;;  %v944_v15 = vld [vmem:[#allocation7 + $0x40] sm:$0xf]  ;;  %s299_s7 = sadd.s32 6, %s1486_s21  ;;  %v1007_v16 = vld [vmem:[#allocation7 + $0x44] sm:$0xf0] }
  0x4a   : > { %504 = vmatpush.bf16.msra.mxu1 %v877_v29  ;;  %536 = vmatpush.bf16.msra.mxu3 %v877_v29  ;;  %v336_v7 = vmul.f32 %v1505_v59, %v335_v4  ;;  %v338_v8 = vstv %s1495_s11  ;;  %s1533_s5 = sld [smem:[#allocation2 + %s297_s28]]  ;;  %v1006_v17 = vld [vmem:[#allocation7 + $0x44] sm:$0xf]  ;;  %v946_v18 = vld [vmem:[#allocation7 + $0x48] sm:$0xf0]  ;;  %v945_v23 = vor.u32 %v1007_v16, %v944_v15  ;;  %s301_s11 = sadd.s32 7, %s1486_s21 }
  0x4b   : > { %v339_v9 = vmul.f32 %v1512_v61, %v338_v8  ;;  %v341_v10 = vstv %s1499_s14  ;;  %s1537_s8 = sld [smem:[#allocation2 + %s293_s30]]  ;;  %v949_v24 = vor.u32 %v1006_v17, %v946_v18  ;;  %v936_v25 = vld [vmem:[#allocation7 + $0x30] sm:$0xf]  ;;  %v1005_v26 = vld [vmem:[#allocation7 + $0x34] sm:$0xf0]  ;;  %s841_s21 = sshll.u32 %s1476_s1, 2 }
  0x4c   : > { %v337_v11 = vadd.f32 %v336_v7, %v334_v3  ;;  %v342_v12 = vmul.f32 %v1519_v2, %v341_v10  ;;  %s1539_s9 = sld [smem:[#allocation2 + %s299_s7]]  ;;  %v311_v20 = vstv %s1508_s22  ;;  %v1004_v28 = vld [vmem:[#allocation7 + $0x34] sm:$0xf]  ;;  %v938_v29 = vld [vmem:[#allocation7 + $0x38] sm:$0xf0]  ;;  %s1014_s13 = sshll.u32 %s1306_s18, 2 }
  0x4d   : > { %492 = vmatpush.bf16.msra.mxu0 %v865_v34  ;;  %524 = vmatpush.bf16.msra.mxu2 %v865_v34  ;;  %v313_v21 = vstv %s1514_s6  ;;  %v312_v30 = vmul.f32 %v311_v20, %v1502_v58  ;;  %s1549_s12 = sld [smem:[#allocation2 + %s301_s11]]  ;;  %v941_v36 = vor.u32 %v1004_v28, %v938_v29  ;;  %v928_v37 = vld [vmem:[#allocation7 + $0x20] sm:$0xf]  ;;  %v1003_v39 = vld [vmem:[#allocation7 + $0x24] sm:$0xf0]  ;;  %s707_s25 = scalar_lea.hbm %s1615_s4, %s1014_s13 }
  0x4e   : > { %505 = vmatpush.bf16.msra.mxu1 %v869_v35  ;;  %537 = vmatpush.bf16.msra.mxu3 %v869_v35  ;;  %v340_v19 = vadd.f32 %v339_v9, %v337_v11  ;;  %v314_v31 = vmul.f32 %v1505_v59, %v313_v21  ;;  %v316_v32 = vstv %s1524_s26  ;;  %v937_v35 = vor.u32 %v1005_v26, %v936_v25  ;;  %v930_v41 = vld [vmem:[#allocation7 + $0x28] sm:$0xf0]  ;;  %v920_v47 = vld [vmem:[#allocation7 + $0x10] sm:$0xf]  ;;  %v912_v3 = vld [vmem:[#allocation7] sm:$0xf] }
  0x4f   : > { %v322_v33 = vstv %s1528_s23  ;;  %v317_v38 = vmul.f32 %v1512_v61, %v316_v32  ;;  %v929_v48 = vor.u32 %v1003_v39, %v928_v37  ;;  %v999_v4 = vld [vmem:[#allocation7 + $0x4] sm:$0xf0]  ;;  %v914_v5 = vld [vmem:[#allocation7 + $0x8] sm:$0xf0]  ;;  %s279_s6 = scalar_lea.vmem [#allocation10], %s841_s21  ;;  %s711_s28 = sshll.u32 %s707_s25, 4  ;;  %s712_s28 = int_to_ptr.hbm [resolvable:$true] %s711_s28 }
  0x50   : > { %v343_v22 = vadd.f32 %v342_v12, %v340_v19  ;;  %v324_v34 = vstv %s1533_s5  ;;  %v323_v44 = vmul.f32 %v322_v33, %v1502_v58  ;;  %v913_v12 = vor.u32 %v999_v4, %v912_v3  ;;  %s709_s0 = sshll.u32 %s279_s6, 4  ;;  %s694_s18 = scalar_lea.sflag [#allocation4], %s1476_s1  ;;  %s710_s0 = int_to_ptr.vmem [resolvable:$true] %s709_s0 }
  0x51   : > { %493 = vmatpush.bf16.msra.mxu0 %v857_v40  ;;  %525 = vmatpush.bf16.msra.mxu2 %v857_v40  ;;  %v1002_v40 = vld [vmem:[#allocation7 + $0x24] sm:$0xf]  ;;  %v319_v43 = vstv %s1537_s8  ;;  %v325_v45 = vmul.f32 %v1505_v59, %v324_v34  ;;  %s1234_s26 = sshra.s32 %s712_s28, 4  ;;  %s1240_s7 = scalar_lea.hbm %s1615_s4, 8  ;;  %s1235_s26 = int_to_ptr.hbm [resolvable:$true] %s1234_s26 }
  0x52   : > { %506 = vmatpush.bf16.msra.mxu1 %v861_v42  ;;  %538 = vmatpush.bf16.msra.mxu3 %v861_v42  ;;  %v1544_v27 = vadd.f32 1e-07, %v343_v22  ;;  %v315_v42 = vadd.f32 %v314_v31, %v312_v30  ;;  %v327_v46 = vstv %s1539_s9  ;;  %v933_v49 = vor.u32 %v1002_v40, %v930_v41  ;;  %s1236_s23 = scalar_lea.hbm %s1235_s26, 4  ;;  %p1241_p10 = scmp.lt.s32.totalorder %s1235_s26, %s1615_s4 }
  0x53   : > { %v320_v54 = vmul.f32 %v1519_v2, %v319_v43  ;;  %v326_v56 = vadd.f32 %v325_v45, %v323_v44  ;;  %v328_v57 = vmul.f32 %v1512_v61, %v327_v46  ;;  %v330_v59 = vstv %s1549_s12  ;;  %v998_v61 = vld [vmem:[#allocation7 + $0x4] sm:$0xf]  ;;  %p1237_p1 = scmp.ne.s32.totalorder %s1235_s26, %s1236_s23  ;;  %p1242_p12 = scmp.lt.s32.totalorder %s1240_s7, %s1236_s23 }
  0x54   : > { %1113 = vrcp.f32 %v1544_v27  ;;  %v318_v55 = vadd.f32 %v317_v38, %v315_v42  ;;  %v356_v60 = vand.u32 2147483648, %v1544_v27  ;;  %vm350_vm0 = vweird.f32 %v1544_v27 }
  0x55   : > { %494 = vmatpush.bf16.msra.mxu0 %v849_v50  ;;  %526 = vmatpush.bf16.msra.mxu2 %v849_v50  ;;  %v1001_v50 = vld [vmem:[#allocation7 + $0x14] sm:$0xf0]  ;;  %v354_v1 = vand.u32 2147483647, %v1544_v27  ;;  %v329_v6 = vadd.f32 %v328_v57, %v326_v56  ;;  %v331_v7 = vmul.f32 %v1519_v2, %v330_v59  ;;  %v1323_v2 = vmov 0.0|0.0   ;;  %p1238_p4 = pnand %p1237_p1, %p1434_p3  ;;  %p1243_p13 = por %p1242_p12, %p1241_p10 }
  0x56   : > { %507 = vmatpush.bf16.msra.mxu1 %v853_v51  ;;  %539 = vmatpush.bf16.msra.mxu3 %v853_v51  ;;  %v1000_v51 = vld [vmem:[#allocation7 + $0x14] sm:$0xf]  ;;  %v921_v62 = vor.u32 %v1001_v50, %v920_v47  ;;  %v321_v9 = vadd.f32 %v320_v54, %v318_v55  ;;  %v357_v10 = vor.u32 1.1754944e-38, %v356_v60  ;;  %v367_v18 = vunpack.c.l.bf16 %v1323_v2 }
  0x57   : > { %vm355_vm3 = vcmp.eq.f32.partialorder %v354_v1, 8.507059e+37  ;;  %v516_v22 = vunpack.c.l.b16 %v1323_v2  ;;  %p1239_p8 = pneg %p1238_p4 }
  0x58   : > { %v369_v25 = vsub.f32 0.0, %v367_v18 }
  0x59   : > { %629 = vmatpush.bf16.msrb.mxu0 %v969_v52  ;;  %657 = vmatpush.bf16.msrb.mxu2 %v969_v52  ;;  %v922_v52 = vld [vmem:[#allocation7 + $0x18] sm:$0xf0]  ;;  %p1244_p0 = pnand %p1243_p13, %p1239_p8 }
  0x5a   : > { %642 = vmatpush.bf16.msrb.mxu1 %v973_v53  ;;  %670 = vmatpush.bf16.msrb.mxu3 %v973_v53  ;;  %v1114_v53 = vpop.eup %1113 }
  0x5b   : > { %v346_v58 = vmul.f32 %v1114_v53, %v1544_v27  ;;  %vm351_vm1 = vweird.f32 %v1114_v53 }
  0x5c   : > { %vm352_vm2 = vmor %vm350_vm0, %vm351_vm1 }
  0x5d   : > { %630 = vmatpush.bf16.msrb.mxu0 %v961_v63  ;;  %658 = vmatpush.bf16.msrb.mxu2 %v961_v63  ;;  %v925_v63 = vor.u32 %v1000_v51, %v922_v52 }
  0x5e   : > { %643 = vmatpush.bf16.msrb.mxu1 %v965_v0  ;;  %671 = vmatpush.bf16.msrb.mxu3 %v965_v0  ;;  %v347_v0 = vsub.f32 1.0, %v346_v58 }
  0x60   : > { %v348_v8 = vmul.f32 %v1114_v53, %v347_v0 }
  0x61   : > { %631 = vmatpush.bf16.msrb.mxu0 %v953_v13  ;;  %659 = vmatpush.bf16.msrb.mxu2 %v953_v13  ;;  %v917_v13 = vor.u32 %v998_v61, %v914_v5 }
  0x62   : > { %644 = vmatpush.bf16.msrb.mxu1 %v957_v14  ;;  %672 = vmatpush.bf16.msrb.mxu3 %v957_v14  ;;  %v349_v11 = vadd.f32 %v1114_v53, %v348_v8  ;;  %v332_v14 = vadd.f32 %v331_v7, %v329_v6 }
  0x64   : > { %v353_v15 = vsel %vm352_vm2, %v1114_v53, %v349_v11 }
  0x65   : > { %632 = vmatpush.bf16.msrb.mxu0 %v945_v23  ;;  %660 = vmatpush.bf16.msrb.mxu2 %v945_v23  ;;  %v358_v16 = vsel %vm355_vm3, %v357_v10, %v353_v15 }
  0x66   : > { %645 = vmatpush.bf16.msrb.mxu1 %v949_v24  ;;  %673 = vmatpush.bf16.msrb.mxu3 %v949_v24  ;;  %v359_v17 = vmul.f32 %v358_v16, %v321_v9  ;;  %v360_v19 = vmul.f32 %v358_v16, %v332_v14 }
  0x68   : > { %v362_v20 = vsel %vm361_vm4, %v359_v17, 0.0  ;;  %v363_v26 = vsel %vm361_vm4, %v360_v19, 0.0 }
  0x69   : > { %633 = vmatpush.bf16.msrb.mxu0 %v937_v35  ;;  %661 = vmatpush.bf16.msrb.mxu2 %v937_v35  ;;  %v364_v21 = vpack.c.bf16 %v362_v20, %v362_v20  ;;  %v371_v30 = vpack.c.bf16 %v363_v26, %v363_v26 }
  0x6a   : > { %646 = vmatpush.bf16.msrb.mxu1 %v941_v36  ;;  %674 = vmatpush.bf16.msrb.mxu3 %v941_v36 }
  0x6b   : > { %v515_v23 = vunpack.c.l.b16 %v364_v21  ;;  %v366_v24 = vunpack.c.l.bf16 %v364_v21  ;;  %v372_v31 = vunpack.c.l.bf16 %v371_v30  ;;  %v546_v33 = vunpack.c.l.b16 %v371_v30 }
  0x6d   : > { %634 = vmatpush.bf16.msrb.mxu0 %v929_v48  ;;  %662 = vmatpush.bf16.msrb.mxu2 %v929_v48  ;;  %v517_v27 = vpack.c.b16 %v516_v22, %v515_v23  ;;  %v368_v28 = vsub.f32 %v362_v20, %v366_v24  ;;  %v373_v32 = vsub.f32 %v363_v26, %v372_v31 }
  0x6e   : > { %647 = vmatpush.bf16.msrb.mxu1 %v933_v49  ;;  %675 = vmatpush.bf16.msrb.mxu3 %v933_v49  ;;  %v547_v35 = vpack.c.b16 %v516_v22, %v546_v33 }
  0x6f   : > { %527 = vmatmul.bf16.vlgmr.msra.gmra.mxu2 %v517_v27  ;;  %540 = vmatmul.bf16.vlgmr.msra.gmra.mxu3 %v517_v27  ;;  %v370_v29 = vpack.c.bf16 %v369_v25, %v368_v28  ;;  %v374_v34 = vpack.c.bf16 %v369_v25, %v373_v32 }
  0x71   : > { %635 = vmatpush.bf16.msrb.mxu0 %v921_v62  ;;  %663 = vmatpush.bf16.msrb.mxu2 %v921_v62 }
  0x72   : > { %648 = vmatpush.bf16.msrb.mxu1 %v925_v63  ;;  %676 = vmatpush.bf16.msrb.mxu3 %v925_v63 }
  0x73   : > { %495 = vmatmul.bf16.vlgmr.msra.gmra.mxu0 %v370_v29  ;;  %508 = vmatmul.bf16.vlgmr.msra.gmra.mxu1 %v370_v29 }
  0x75   : > { %636 = vmatpush.bf16.msrb.mxu0 %v913_v12  ;;  %664 = vmatpush.bf16.msrb.mxu2 %v913_v12 }
  0x76   : > { %649 = vmatpush.bf16.msrb.mxu1 %v917_v13  ;;  %677 = vmatpush.bf16.msrb.mxu3 %v917_v13 }
  0x7f   : > { %665 = vmatmul.bf16.vlgmr.msrb.gmra.mxu2 %v374_v34  ;;  %678 = vmatmul.bf16.vlgmr.msrb.gmra.mxu3 %v374_v34 }
  0x83   : > { %637 = vmatmul.bf16.vlgmr.msrb.gmra.mxu0 %v547_v35  ;;  %650 = vmatmul.bf16.vlgmr.msrb.gmra.mxu1 %v547_v35 }
  0xf0   : > { %v496_v36 = vpop.f32.mrf.mxu0  ;;  %v509_v37 = vpop.f32.mrf.mxu1 }
  0xf2   : > { %v528_v38 = vpop.f32.mrf.mxu2  ;;  %v541_v39 = vpop.f32.mrf.mxu3 }
  0xf3   : > { %v529_v46 = vadd.f32 %v528_v38, %v496_v36  ;;  %v542_v47 = vadd.f32 %v541_v39, %v509_v37 }
  0xf8   : > { %v498_v40 = vpop.f32.mrf.mxu0  ;;  %v511_v41 = vpop.f32.mrf.mxu1 }
  0xfa   : > { %v530_v42 = vpop.f32.mrf.mxu2  ;;  %v543_v43 = vpop.f32.mrf.mxu3 }
 0x100   : > { %v638_v44 = vpop.f32.mrf.mxu0  ;;  %v651_v45 = vpop.f32.mrf.mxu1 }
 0x101   : > { %v655_v48 = vadd.f32 %v638_v44, %v529_v46  ;;  %v656_v49 = vadd.f32 %v651_v45, %v542_v47 }
 0x102   : > { %v666_v50 = vpop.f32.mrf.mxu2  ;;  %v679_v51 = vpop.f32.mrf.mxu3 }
 0x103   : > { %v683_v52 = vadd.f32 %v666_v50, %v655_v48  ;;  %v684_v53 = vadd.f32 %v679_v51, %v656_v49 }
 0x105   : > { %v975_v54 = vadd.f32 -1.0, %v684_v53  ;;  %v974_v57 = vadd.f32 -1.0, %v683_v52 }
 0x107   : > { %v689_v58 = vrot.slane %v975_v54, 6 }
 0x108   : > { %v640_v55 = vpop.f32.mrf.mxu0  ;;  %v653_v56 = vpop.f32.mrf.mxu1 }
 0x109   : > { %v690_v59 = vsel %vm361_vm4, %v974_v57, %v689_v58 }
 0x10a   : > { %v668_v60 = vpop.f32.mrf.mxu2  ;;  %v681_v62 = vpop.f32.mrf.mxu3  ;;  %692 = vst [vmem:[%s279_s6] sm:$0xf] %v690_v59 }
 0x10b   : > { %1247 = shalt.err (!%p1244_p0)
}
 0x10c   : > { %1029 = dma.vmem_to_hbm [thread:$0]  (%p1434_p3), %s710_s0, 64, %s712_s28, %s694_s18  }
 0x10d PF: > { %s723_s1 = sand.u32 1, %s1294_s15   ;;  %p1046_p5 = pnand %p832_p11, %p1394_p6 }
 0x10e   : > { %s724_s11 = scalar_lea.sflag [#allocation4], %s723_s1 }
 0x10f   : > { %p1047_p7 = pneg %p1046_p5 }
 0x111   : > { %1289 = dma.done.wait (%p1047_p7), %s724_s11, 64  }
 0x112   : > { %1291 = vsyncadd (%p1047_p7), %s724_s11, 4294967232  ;;  %s20_s20 = sadd.s32 1, %s1314_s20   ;;  %s1626_s15 = smov %s1298_s16 }
 0x113   : > { %p17_p9 = scmp.ge.s32.totalorder %s20_s20, 4   ;;  %s1627_s16 = smov %s1302_s17 }
 0x114   : > { %s1628_s17 = smov %s1451_s10  ;;  %s1629_s18 = smov %s1310_s19 }
 0x115   : > { %s1630_s19 = smov %s1632_s27  ;;  %19 = sbr.rel (!%p17_p9) target bundleno = 10 (0xa), region = 96 }
 0x11a   :  { %730 = vsyncpa [#allocation3], 1 }
 0x11b   :  { %732 = vsyncpa [#allocation3 + $0x1], 1 }
 0x11c   :  { %733 = vsyncpa [#allocation8], 1 }
 0x11d   :  { %734 = vsyncpa [#allocation4], 1 }
 0x11e   :  { %736 = vsyncpa [#allocation4 + $0x1], 1 }
 0x11f   :  { %737 = vsyncpa [#allocation5], 1 }
 0x120   :  { %739 = vsyncpa [#allocation5 + $0x1], 1 }

</bundles_post_ra>
